<compile_context>
chip_gen: v7x
topology: tpu7x:2x2x1
jax: 0.10.0
libtpu: 0.0.40
codegen_flags: <defaults>
</compile_context>

<pallas_src>
import jax
import jax.numpy as jnp
from jax.experimental import pallas as pl
from jax.experimental.pallas import tpu as pltpu


def _inception2_kernel(x_ref, w_ref, b_ref, o_ref):
    # x_ref: (TB, C_in, L) bf16   w_ref: (C_out, C_in) bf16   b_ref: (C_out, 1) f32
    # o_ref: (TB, 2*L)  -- columns [0:L] = channel mean, [L:2L] = channel max
    TB = x_ref.shape[0]
    L = x_ref.shape[2]

    w = w_ref[...]        # resident weight tile (bf16)
    bias = b_ref[...]     # (C_out, 1) f32

    # Static unroll over the TB sub-batches in this block (TB is a compile-time
    # block constant, capped small by the wrapper).
    for b in range(TB):
        xb = x_ref[b]                                                   # (C_in, L) bf16
        # k=1 Conv1d == channel matmul; bf16 inputs, f32 accumulation on the MXU.
        y = jnp.dot(w, xb, preferred_element_type=jnp.float32)          # (C_out, L) f32
        y = jnp.maximum(y + bias, 0.0)                                  # bias + ReLU (f32, VPU)

        mean_row = jnp.mean(y, axis=0, keepdims=True)                   # (1, L) cross-sublane reduce
        max_row = jnp.max(y, axis=0, keepdims=True)                     # (1, L)

        # Lane-dense static-slice stores into the (TB, 2L) output block.
        o_ref[b:b + 1, 0:L] = mean_row.astype(o_ref.dtype)
        o_ref[b:b + 1, L:2 * L] = max_row.astype(o_ref.dtype)


def _pick_tb(B, C_in, L, itemsize, target_bytes=1 << 20, max_unroll=32):
    """Pick the batch-block size TB: a divisor of B, big enough that the activation
    DMA is ~target_bytes (if B allows), capped for unroll/compile time, and keeping
    >= 2 grid steps when B >= 2 so v7x can use both TensorCores. Prefer multiples
    of 8 for sublane-aligned output blocks."""
    per_batch = max(1, C_in * L * itemsize)
    want = max(1, min(B, target_bytes // per_batch, max_unroll))
    if B >= 2:
        want = min(want, max(1, B // 2))      # keep at least 2 (parallel) grid steps
    divisors = [d for d in range(1, B + 1) if B % d == 0 and d <= want]
    aligned = [d for d in divisors if d % 8 == 0]
    return max(aligned) if aligned else max(divisors)


def inception2(x, weight, bias, *, compute_dtype=jnp.bfloat16):
    """x: [B, C_in, L]; weight: [C_out, C_in, 1] (PyTorch Conv1d k=1 layout) or
    [C_out, C_in]; bias: [C_out].  Returns [B, 2*L] = cat(mean_c(relu(conv)), max_c(...))."""
    B, C_in, L = x.shape
    C_out = weight.shape[0]

    # Metadata-only reshapes (no transpose): squeeze the k=1 tap, keep bias 2-D.
    w2 = weight.reshape(C_out, C_in).astype(compute_dtype)   # streamed / resident in bf16
    b2 = bias.reshape(C_out, 1).astype(jnp.float32)          # bias stays f32
    xs = x.astype(compute_dtype)                             # halve the dominant HBM read stream

    TB = _pick_tb(B, C_in, L, jnp.dtype(compute_dtype).itemsize)
    grid = (B // TB,)

    out = pl.pallas_call(
        _inception2_kernel,
        out_shape=jax.ShapeDtypeStruct((B, 2 * L), x.dtype),
        grid=grid,
        in_specs=[
            # Activations stream, TB batches per step (larger DMAs, fewer steps).
            pl.BlockSpec((TB, C_in, L), lambda i: (i, 0, 0)),
            # Weight / bias: constant index_map -> VMEM-resident across the grid.
            pl.BlockSpec((C_out, C_in), lambda i: (0, 0)),
            pl.BlockSpec((C_out, 1), lambda i: (0, 0)),
        ],
        # Final [B, 2L] layout emitted directly: lane-dense, no wrapper reshape.
        out_specs=pl.BlockSpec((TB, 2 * L), lambda i: (i, 0)),
        compiler_params=pltpu.CompilerParams(
            dimension_semantics=("parallel",)),   # batch-block axis shardable across TCs (v7x)
    )(xs, w2, b2)
    return out


def inception2_ref(x, weight, bias, compute_dtype=jnp.bfloat16):
    """Pure-JAX reference using the same bf16 input streaming + f32 accumulation."""
    C_out, C_in = weight.shape[0], weight.shape[1]
    w = weight.reshape(C_out, C_in).astype(compute_dtype)
    y = jnp.einsum("oc,bcl->bol", w, x.astype(compute_dtype),
                   preferred_element_type=jnp.float32)
    y = jnp.maximum(y + bias[None, :, None].astype(jnp.float32), 0.0)
    res = jnp.concatenate([jnp.mean(y, axis=1), jnp.max(y, axis=1)], axis=1)
    return res.astype(x.dtype)


if __name__ == "__main__":
    # Small shapes consistent with the module: input_dim=8 channels, conv_dim=64
    # (module default), seq length L=128 (lane-dense output), batch=16 so the
    # batch-blocked grid has 2 parallel steps of TB=8.
    B, C_in, C_out, L = 16, 8, 64, 128

    key = jax.random.PRNGKey(0)
    kx, kw, kb = jax.random.split(key, 3)

    x = jax.random.normal(kx, (B, C_in, L), dtype=jnp.float32)

    # Params mimicking nn.Conv1d init: uniform(-1/sqrt(C_in*k), 1/sqrt(C_in*k)), k=1.
    bound = 1.0 / (C_in ** 0.5)
    weight = jax.random.uniform(kw, (C_out, C_in, 1), jnp.float32, -bound, bound)
    bias = jax.random.uniform(kb, (C_out,), jnp.float32, -bound, bound)

    out = jax.block_until_ready(inception2(x, weight, bias))
    ref = inception2_ref(x, weight, bias)

    assert out.shape == (B, 2 * L), f"bad shape {out.shape}"
    # bf16 input streaming -> relaxed tolerance vs the identically-cast reference.
    assert jnp.allclose(out, ref, atol=1e-3, rtol=1e-3), "mismatch vs reference"

    print("KERNEL_OK")
</pallas_src>

<mosaic_0001>
module attributes {stable_mosaic.version = 11 : i64} {
  func.func @_inception2_kernel(%arg0: i32, %arg1: memref<8x8x128xbf16, #tpu.memory_space<vmem>>, %arg2: memref<64x8xbf16, #tpu.memory_space<vmem>>, %arg3: memref<64x1xf32, #tpu.memory_space<vmem>>, %arg4: memref<8x256xf32, #tpu.memory_space<vmem>>) attributes {dimension_semantics = [#tpu.dimension_semantics<parallel>], iteration_bounds = array<i64: 2>, scalar_prefetch = 0 : i64, scratch_operands = 0 : i64, tpu.core_type = #tpu.core_type<tc>, window_params = [{transform_indices = @transform_0, window_bounds = array<i64: 8, 8, 128>}, {pipeline_mode = #tpu.pipeline_mode<synchronous>, transform_indices = @transform_1, window_bounds = array<i64: 64, 8>}, {pipeline_mode = #tpu.pipeline_mode<synchronous>, transform_indices = @transform_2, window_bounds = array<i64: 64, 1>}, {transform_indices = @transform_3, window_bounds = array<i64: 8, 256>}]} {
    %c0 = arith.constant 0 : index
    %c0_0 = arith.constant 0 : index
    %0 = vector.load %arg2[%c0, %c0_0] : memref<64x8xbf16, #tpu.memory_space<vmem>>, vector<64x8xbf16>
    %c0_1 = arith.constant 0 : index
    %c0_2 = arith.constant 0 : index
    %1 = vector.load %arg3[%c0_1, %c0_2] : memref<64x1xf32, #tpu.memory_space<vmem>>, vector<64x1xf32>
    %c0_3 = arith.constant 0 : index
    %c0_4 = arith.constant 0 : index
    %c0_5 = arith.constant 0 : index
    %2 = vector.load %arg1[%c0_3, %c0_4, %c0_5] : memref<8x8x128xbf16, #tpu.memory_space<vmem>>, vector<1x8x128xbf16>
    %3 = vector.shape_cast %2 : vector<1x8x128xbf16> to vector<8x128xbf16>
    %cst = arith.constant dense<0.000000e+00> : vector<64x128xf32>
    %4 = tpu.matmul %0, %3, %cst {dimension_numbers = #tpu.dot_dimension_numbers<[1], [0], [0], [1], [0, 0, 1, 1], [], []>} : vector<64x8xbf16>, vector<8x128xbf16>, vector<64x128xf32> -> vector<64x128xf32>
    %5 = vector.broadcast %1 : vector<64x1xf32> to vector<64x128xf32>
    %6 = arith.addf %4, %5 : vector<64x128xf32>
    %cst_6 = arith.constant 0.000000e+00 : f32
    %7 = vector.broadcast %cst_6 : f32 to vector<64x128xf32>
    %8 = arith.maximumf %6, %7 : vector<64x128xf32>
    %cst_7 = arith.constant dense<0.000000e+00> : vector<128xf32>
    %9 = vector.multi_reduction <add>, %8, %cst_7 [0] : vector<64x128xf32> to vector<128xf32>
    %10 = vector.shape_cast %9 : vector<128xf32> to vector<1x128xf32>
    %cst_8 = arith.constant 6.400000e+01 : f32
    %11 = vector.broadcast %cst_8 : f32 to vector<1x128xf32>
    %12 = arith.divf %10, %11 : vector<1x128xf32>
    %cst_9 = arith.constant dense<0xFF800000> : vector<128xf32>
    %13 = vector.multi_reduction <maximumf>, %8, %cst_9 [0] : vector<64x128xf32> to vector<128xf32>
    %14 = vector.shape_cast %13 : vector<128xf32> to vector<1x128xf32>
    %c0_10 = arith.constant 0 : index
    %c0_11 = arith.constant 0 : index
    %15 = vector.load %arg4[%c0_10, %c0_11] : memref<8x256xf32, #tpu.memory_space<vmem>>, vector<1x128xf32>
    tpu.vector_store %arg4[%c0_10, %c0_11], %12 {strides = array<i32>} : memref<8x256xf32, #tpu.memory_space<vmem>>, vector<1x128xf32>,
    %c0_12 = arith.constant 0 : index
    %c128 = arith.constant 128 : index
    %16 = vector.load %arg4[%c0_12, %c128] : memref<8x256xf32, #tpu.memory_space<vmem>>, vector<1x128xf32>
    tpu.vector_store %arg4[%c0_12, %c128], %14 {strides = array<i32>} : memref<8x256xf32, #tpu.memory_space<vmem>>, vector<1x128xf32>,
    %c1 = arith.constant 1 : index
    %c0_13 = arith.constant 0 : index
    %c0_14 = arith.constant 0 : index
    %17 = vector.load %arg1[%c1, %c0_13, %c0_14] : memref<8x8x128xbf16, #tpu.memory_space<vmem>>, vector<1x8x128xbf16>
    %18 = vector.shape_cast %17 : vector<1x8x128xbf16> to vector<8x128xbf16>
    %cst_15 = arith.constant dense<0.000000e+00> : vector<64x128xf32>
    %19 = tpu.matmul %0, %18, %cst_15 {dimension_numbers = #tpu.dot_dimension_numbers<[1], [0], [0], [1], [0, 0, 1, 1], [], []>} : vector<64x8xbf16>, vector<8x128xbf16>, vector<64x128xf32> -> vector<64x128xf32>
    %20 = vector.broadcast %1 : vector<64x1xf32> to vector<64x128xf32>
    %21 = arith.addf %19, %20 : vector<64x128xf32>
    %cst_16 = arith.constant 0.000000e+00 : f32
    %22 = vector.broadcast %cst_16 : f32 to vector<64x128xf32>
    %23 = arith.maximumf %21, %22 : vector<64x128xf32>
    %cst_17 = arith.constant dense<0.000000e+00> : vector<128xf32>
    %24 = vector.multi_reduction <add>, %23, %cst_17 [0] : vector<64x128xf32> to vector<128xf32>
    %25 = vector.shape_cast %24 : vector<128xf32> to vector<1x128xf32>
    %cst_18 = arith.constant 6.400000e+01 : f32
    %26 = vector.broadcast %cst_18 : f32 to vector<1x128xf32>
    %27 = arith.divf %25, %26 : vector<1x128xf32>
    %cst_19 = arith.constant dense<0xFF800000> : vector<128xf32>
    %28 = vector.multi_reduction <maximumf>, %23, %cst_19 [0] : vector<64x128xf32> to vector<128xf32>
    %29 = vector.shape_cast %28 : vector<128xf32> to vector<1x128xf32>
    %c1_20 = arith.constant 1 : index
    %c0_21 = arith.constant 0 : index
    %30 = vector.load %arg4[%c1_20, %c0_21] : memref<8x256xf32, #tpu.memory_space<vmem>>, vector<1x128xf32>
    tpu.vector_store %arg4[%c1_20, %c0_21], %27 {strides = array<i32>} : memref<8x256xf32, #tpu.memory_space<vmem>>, vector<1x128xf32>,
    %c1_22 = arith.constant 1 : index
    %c128_23 = arith.constant 128 : index
    %31 = vector.load %arg4[%c1_22, %c128_23] : memref<8x256xf32, #tpu.memory_space<vmem>>, vector<1x128xf32>
    tpu.vector_store %arg4[%c1_22, %c128_23], %29 {strides = array<i32>} : memref<8x256xf32, #tpu.memory_space<vmem>>, vector<1x128xf32>,
    %c2 = arith.constant 2 : index
    %c0_24 = arith.constant 0 : index
    %c0_25 = arith.constant 0 : index
    %32 = vector.load %arg1[%c2, %c0_24, %c0_25] : memref<8x8x128xbf16, #tpu.memory_space<vmem>>, vector<1x8x128xbf16>
    %33 = vector.shape_cast %32 : vector<1x8x128xbf16> to vector<8x128xbf16>
    %cst_26 = arith.constant dense<0.000000e+00> : vector<64x128xf32>
    %34 = tpu.matmul %0, %33, %cst_26 {dimension_numbers = #tpu.dot_dimension_numbers<[1], [0], [0], [1], [0, 0, 1, 1], [], []>} : vector<64x8xbf16>, vector<8x128xbf16>, vector<64x128xf32> -> vector<64x128xf32>
    %35 = vector.broadcast %1 : vector<64x1xf32> to vector<64x128xf32>
    %36 = arith.addf %34, %35 : vector<64x128xf32>
    %cst_27 = arith.constant 0.000000e+00 : f32
    %37 = vector.broadcast %cst_27 : f32 to vector<64x128xf32>
    %38 = arith.maximumf %36, %37 : vector<64x128xf32>
    %cst_28 = arith.constant dense<0.000000e+00> : vector<128xf32>
    %39 = vector.multi_reduction <add>, %38, %cst_28 [0] : vector<64x128xf32> to vector<128xf32>
    %40 = vector.shape_cast %39 : vector<128xf32> to vector<1x128xf32>
    %cst_29 = arith.constant 6.400000e+01 : f32
    %41 = vector.broadcast %cst_29 : f32 to vector<1x128xf32>
    %42 = arith.divf %40, %41 : vector<1x128xf32>
    %cst_30 = arith.constant dense<0xFF800000> : vector<128xf32>
    %43 = vector.multi_reduction <maximumf>, %38, %cst_30 [0] : vector<64x128xf32> to vector<128xf32>
    %44 = vector.shape_cast %43 : vector<128xf32> to vector<1x128xf32>
    %c2_31 = arith.constant 2 : index
    %c0_32 = arith.constant 0 : index
    %45 = vector.load %arg4[%c2_31, %c0_32] : memref<8x256xf32, #tpu.memory_space<vmem>>, vector<1x128xf32>
    tpu.vector_store %arg4[%c2_31, %c0_32], %42 {strides = array<i32>} : memref<8x256xf32, #tpu.memory_space<vmem>>, vector<1x128xf32>,
    %c2_33 = arith.constant 2 : index
    %c128_34 = arith.constant 128 : index
    %46 = vector.load %arg4[%c2_33, %c128_34] : memref<8x256xf32, #tpu.memory_space<vmem>>, vector<1x128xf32>
    tpu.vector_store %arg4[%c2_33, %c128_34], %44 {strides = array<i32>} : memref<8x256xf32, #tpu.memory_space<vmem>>, vector<1x128xf32>,
    %c3 = arith.constant 3 : index
    %c0_35 = arith.constant 0 : index
    %c0_36 = arith.constant 0 : index
    %47 = vector.load %arg1[%c3, %c0_35, %c0_36] : memref<8x8x128xbf16, #tpu.memory_space<vmem>>, vector<1x8x128xbf16>
    %48 = vector.shape_cast %47 : vector<1x8x128xbf16> to vector<8x128xbf16>
    %cst_37 = arith.constant dense<0.000000e+00> : vector<64x128xf32>
    %49 = tpu.matmul %0, %48, %cst_37 {dimension_numbers = #tpu.dot_dimension_numbers<[1], [0], [0], [1], [0, 0, 1, 1], [], []>} : vector<64x8xbf16>, vector<8x128xbf16>, vector<64x128xf32> -> vector<64x128xf32>
    %50 = vector.broadcast %1 : vector<64x1xf32> to vector<64x128xf32>
    %51 = arith.addf %49, %50 : vector<64x128xf32>
    %cst_38 = arith.constant 0.000000e+00 : f32
    %52 = vector.broadcast %cst_38 : f32 to vector<64x128xf32>
    %53 = arith.maximumf %51, %52 : vector<64x128xf32>
    %cst_39 = arith.constant dense<0.000000e+00> : vector<128xf32>
    %54 = vector.multi_reduction <add>, %53, %cst_39 [0] : vector<64x128xf32> to vector<128xf32>
    %55 = vector.shape_cast %54 : vector<128xf32> to vector<1x128xf32>
    %cst_40 = arith.constant 6.400000e+01 : f32
    %56 = vector.broadcast %cst_40 : f32 to vector<1x128xf32>
    %57 = arith.divf %55, %56 : vector<1x128xf32>
    %cst_41 = arith.constant dense<0xFF800000> : vector<128xf32>
    %58 = vector.multi_reduction <maximumf>, %53, %cst_41 [0] : vector<64x128xf32> to vector<128xf32>
    %59 = vector.shape_cast %58 : vector<128xf32> to vector<1x128xf32>
    %c3_42 = arith.constant 3 : index
    %c0_43 = arith.constant 0 : index
    %60 = vector.load %arg4[%c3_42, %c0_43] : memref<8x256xf32, #tpu.memory_space<vmem>>, vector<1x128xf32>
    tpu.vector_store %arg4[%c3_42, %c0_43], %57 {strides = array<i32>} : memref<8x256xf32, #tpu.memory_space<vmem>>, vector<1x128xf32>,
    %c3_44 = arith.constant 3 : index
    %c128_45 = arith.constant 128 : index
    %61 = vector.load %arg4[%c3_44, %c128_45] : memref<8x256xf32, #tpu.memory_space<vmem>>, vector<1x128xf32>
    tpu.vector_store %arg4[%c3_44, %c128_45], %59 {strides = array<i32>} : memref<8x256xf32, #tpu.memory_space<vmem>>, vector<1x128xf32>,
    %c4 = arith.constant 4 : index
    %c0_46 = arith.constant 0 : index
    %c0_47 = arith.constant 0 : index
    %62 = vector.load %arg1[%c4, %c0_46, %c0_47] : memref<8x8x128xbf16, #tpu.memory_space<vmem>>, vector<1x8x128xbf16>
    %63 = vector.shape_cast %62 : vector<1x8x128xbf16> to vector<8x128xbf16>
    %cst_48 = arith.constant dense<0.000000e+00> : vector<64x128xf32>
    %64 = tpu.matmul %0, %63, %cst_48 {dimension_numbers = #tpu.dot_dimension_numbers<[1], [0], [0], [1], [0, 0, 1, 1], [], []>} : vector<64x8xbf16>, vector<8x128xbf16>, vector<64x128xf32> -> vector<64x128xf32>
    %65 = vector.broadcast %1 : vector<64x1xf32> to vector<64x128xf32>
    %66 = arith.addf %64, %65 : vector<64x128xf32>
    %cst_49 = arith.constant 0.000000e+00 : f32
    %67 = vector.broadcast %cst_49 : f32 to vector<64x128xf32>
    %68 = arith.maximumf %66, %67 : vector<64x128xf32>
    %cst_50 = arith.constant dense<0.000000e+00> : vector<128xf32>
    %69 = vector.multi_reduction <add>, %68, %cst_50 [0] : vector<64x128xf32> to vector<128xf32>
    %70 = vector.shape_cast %69 : vector<128xf32> to vector<1x128xf32>
    %cst_51 = arith.constant 6.400000e+01 : f32
    %71 = vector.broadcast %cst_51 : f32 to vector<1x128xf32>
    %72 = arith.divf %70, %71 : vector<1x128xf32>
    %cst_52 = arith.constant dense<0xFF800000> : vector<128xf32>
    %73 = vector.multi_reduction <maximumf>, %68, %cst_52 [0] : vector<64x128xf32> to vector<128xf32>
    %74 = vector.shape_cast %73 : vector<128xf32> to vector<1x128xf32>
    %c4_53 = arith.constant 4 : index
    %c0_54 = arith.constant 0 : index
    %75 = vector.load %arg4[%c4_53, %c0_54] : memref<8x256xf32, #tpu.memory_space<vmem>>, vector<1x128xf32>
    tpu.vector_store %arg4[%c4_53, %c0_54], %72 {strides = array<i32>} : memref<8x256xf32, #tpu.memory_space<vmem>>, vector<1x128xf32>,
    %c4_55 = arith.constant 4 : index
    %c128_56 = arith.constant 128 : index
    %76 = vector.load %arg4[%c4_55, %c128_56] : memref<8x256xf32, #tpu.memory_space<vmem>>, vector<1x128xf32>
    tpu.vector_store %arg4[%c4_55, %c128_56], %74 {strides = array<i32>} : memref<8x256xf32, #tpu.memory_space<vmem>>, vector<1x128xf32>,
    %c5 = arith.constant 5 : index
    %c0_57 = arith.constant 0 : index
    %c0_58 = arith.constant 0 : index
    %77 = vector.load %arg1[%c5, %c0_57, %c0_58] : memref<8x8x128xbf16, #tpu.memory_space<vmem>>, vector<1x8x128xbf16>
    %78 = vector.shape_cast %77 : vector<1x8x128xbf16> to vector<8x128xbf16>
    %cst_59 = arith.constant dense<0.000000e+00> : vector<64x128xf32>
    %79 = tpu.matmul %0, %78, %cst_59 {dimension_numbers = #tpu.dot_dimension_numbers<[1], [0], [0], [1], [0, 0, 1, 1], [], []>} : vector<64x8xbf16>, vector<8x128xbf16>, vector<64x128xf32> -> vector<64x128xf32>
    %80 = vector.broadcast %1 : vector<64x1xf32> to vector<64x128xf32>
    %81 = arith.addf %79, %80 : vector<64x128xf32>
    %cst_60 = arith.constant 0.000000e+00 : f32
    %82 = vector.broadcast %cst_60 : f32 to vector<64x128xf32>
    %83 = arith.maximumf %81, %82 : vector<64x128xf32>
    %cst_61 = arith.constant dense<0.000000e+00> : vector<128xf32>
    %84 = vector.multi_reduction <add>, %83, %cst_61 [0] : vector<64x128xf32> to vector<128xf32>
    %85 = vector.shape_cast %84 : vector<128xf32> to vector<1x128xf32>
    %cst_62 = arith.constant 6.400000e+01 : f32
    %86 = vector.broadcast %cst_62 : f32 to vector<1x128xf32>
    %87 = arith.divf %85, %86 : vector<1x128xf32>
    %cst_63 = arith.constant dense<0xFF800000> : vector<128xf32>
    %88 = vector.multi_reduction <maximumf>, %83, %cst_63 [0] : vector<64x128xf32> to vector<128xf32>
    %89 = vector.shape_cast %88 : vector<128xf32> to vector<1x128xf32>
    %c5_64 = arith.constant 5 : index
    %c0_65 = arith.constant 0 : index
    %90 = vector.load %arg4[%c5_64, %c0_65] : memref<8x256xf32, #tpu.memory_space<vmem>>, vector<1x128xf32>
    tpu.vector_store %arg4[%c5_64, %c0_65], %87 {strides = array<i32>} : memref<8x256xf32, #tpu.memory_space<vmem>>, vector<1x128xf32>,
    %c5_66 = arith.constant 5 : index
    %c128_67 = arith.constant 128 : index
    %91 = vector.load %arg4[%c5_66, %c128_67] : memref<8x256xf32, #tpu.memory_space<vmem>>, vector<1x128xf32>
    tpu.vector_store %arg4[%c5_66, %c128_67], %89 {strides = array<i32>} : memref<8x256xf32, #tpu.memory_space<vmem>>, vector<1x128xf32>,
    %c6 = arith.constant 6 : index
    %c0_68 = arith.constant 0 : index
    %c0_69 = arith.constant 0 : index
    %92 = vector.load %arg1[%c6, %c0_68, %c0_69] : memref<8x8x128xbf16, #tpu.memory_space<vmem>>, vector<1x8x128xbf16>
    %93 = vector.shape_cast %92 : vector<1x8x128xbf16> to vector<8x128xbf16>
    %cst_70 = arith.constant dense<0.000000e+00> : vector<64x128xf32>
    %94 = tpu.matmul %0, %93, %cst_70 {dimension_numbers = #tpu.dot_dimension_numbers<[1], [0], [0], [1], [0, 0, 1, 1], [], []>} : vector<64x8xbf16>, vector<8x128xbf16>, vector<64x128xf32> -> vector<64x128xf32>
    %95 = vector.broadcast %1 : vector<64x1xf32> to vector<64x128xf32>
    %96 = arith.addf %94, %95 : vector<64x128xf32>
    %cst_71 = arith.constant 0.000000e+00 : f32
    %97 = vector.broadcast %cst_71 : f32 to vector<64x128xf32>
    %98 = arith.maximumf %96, %97 : vector<64x128xf32>
    %cst_72 = arith.constant dense<0.000000e+00> : vector<128xf32>
    %99 = vector.multi_reduction <add>, %98, %cst_72 [0] : vector<64x128xf32> to vector<128xf32>
    %100 = vector.shape_cast %99 : vector<128xf32> to vector<1x128xf32>
    %cst_73 = arith.constant 6.400000e+01 : f32
    %101 = vector.broadcast %cst_73 : f32 to vector<1x128xf32>
    %102 = arith.divf %100, %101 : vector<1x128xf32>
    %cst_74 = arith.constant dense<0xFF800000> : vector<128xf32>
    %103 = vector.multi_reduction <maximumf>, %98, %cst_74 [0] : vector<64x128xf32> to vector<128xf32>
    %104 = vector.shape_cast %103 : vector<128xf32> to vector<1x128xf32>
    %c6_75 = arith.constant 6 : index
    %c0_76 = arith.constant 0 : index
    %105 = vector.load %arg4[%c6_75, %c0_76] : memref<8x256xf32, #tpu.memory_space<vmem>>, vector<1x128xf32>
    tpu.vector_store %arg4[%c6_75, %c0_76], %102 {strides = array<i32>} : memref<8x256xf32, #tpu.memory_space<vmem>>, vector<1x128xf32>,
    %c6_77 = arith.constant 6 : index
    %c128_78 = arith.constant 128 : index
    %106 = vector.load %arg4[%c6_77, %c128_78] : memref<8x256xf32, #tpu.memory_space<vmem>>, vector<1x128xf32>
    tpu.vector_store %arg4[%c6_77, %c128_78], %104 {strides = array<i32>} : memref<8x256xf32, #tpu.memory_space<vmem>>, vector<1x128xf32>,
    %c7 = arith.constant 7 : index
    %c0_79 = arith.constant 0 : index
    %c0_80 = arith.constant 0 : index
    %107 = vector.load %arg1[%c7, %c0_79, %c0_80] : memref<8x8x128xbf16, #tpu.memory_space<vmem>>, vector<1x8x128xbf16>
    %108 = vector.shape_cast %107 : vector<1x8x128xbf16> to vector<8x128xbf16>
    %cst_81 = arith.constant dense<0.000000e+00> : vector<64x128xf32>
    %109 = tpu.matmul %0, %108, %cst_81 {dimension_numbers = #tpu.dot_dimension_numbers<[1], [0], [0], [1], [0, 0, 1, 1], [], []>} : vector<64x8xbf16>, vector<8x128xbf16>, vector<64x128xf32> -> vector<64x128xf32>
    %110 = vector.broadcast %1 : vector<64x1xf32> to vector<64x128xf32>
    %111 = arith.addf %109, %110 : vector<64x128xf32>
    %cst_82 = arith.constant 0.000000e+00 : f32
    %112 = vector.broadcast %cst_82 : f32 to vector<64x128xf32>
    %113 = arith.maximumf %111, %112 : vector<64x128xf32>
    %cst_83 = arith.constant dense<0.000000e+00> : vector<128xf32>
    %114 = vector.multi_reduction <add>, %113, %cst_83 [0] : vector<64x128xf32> to vector<128xf32>
    %115 = vector.shape_cast %114 : vector<128xf32> to vector<1x128xf32>
    %cst_84 = arith.constant 6.400000e+01 : f32
    %116 = vector.broadcast %cst_84 : f32 to vector<1x128xf32>
    %117 = arith.divf %115, %116 : vector<1x128xf32>
    %cst_85 = arith.constant dense<0xFF800000> : vector<128xf32>
    %118 = vector.multi_reduction <maximumf>, %113, %cst_85 [0] : vector<64x128xf32> to vector<128xf32>
    %119 = vector.shape_cast %118 : vector<128xf32> to vector<1x128xf32>
    %c7_86 = arith.constant 7 : index
    %c0_87 = arith.constant 0 : index
    %120 = vector.load %arg4[%c7_86, %c0_87] : memref<8x256xf32, #tpu.memory_space<vmem>>, vector<1x128xf32>
    tpu.vector_store %arg4[%c7_86, %c0_87], %117 {strides = array<i32>} : memref<8x256xf32, #tpu.memory_space<vmem>>, vector<1x128xf32>,
    %c7_88 = arith.constant 7 : index
    %c128_89 = arith.constant 128 : index
    %121 = vector.load %arg4[%c7_88, %c128_89] : memref<8x256xf32, #tpu.memory_space<vmem>>, vector<1x128xf32>
    tpu.vector_store %arg4[%c7_88, %c128_89], %119 {strides = array<i32>} : memref<8x256xf32, #tpu.memory_space<vmem>>, vector<1x128xf32>,
    return
  }
  func.func @transform_0(%arg0: i32) -> (i32, i32, i32) {
    %c0_i32 = arith.constant 0 : i32
    %c0_i32_0 = arith.constant 0 : i32
    %c0_i32_1 = arith.constant 0 : i32
    return %arg0, %c0_i32, %c0_i32_0 : i32, i32, i32
  }
  func.func @transform_1(%arg0: i32) -> (i32, i32) {
    %c0_i32 = arith.constant 0 : i32
    %c0_i32_0 = arith.constant 0 : i32
    %c0_i32_1 = arith.constant 0 : i32
    return %c0_i32, %c0_i32_0 : i32, i32
  }
  func.func @transform_2(%arg0: i32) -> (i32, i32) {
    %c0_i32 = arith.constant 0 : i32
    %c0_i32_0 = arith.constant 0 : i32
    %c0_i32_1 = arith.constant 0 : i32
    return %c0_i32, %c0_i32_0 : i32, i32
  }
  func.func @transform_3(%arg0: i32) -> (i32, i32) {
    %c0_i32 = arith.constant 0 : i32
    %c0_i32_0 = arith.constant 0 : i32
    return %arg0, %c0_i32 : i32, i32
  }
}

</mosaic_0001>

<bundles_post_ra>
// kernel: tpu_custom_call.1
= control target key start
LH: loop header
LB: loop body
LE: loop exit
PB: predicated region body
PF: predicated region fallthrough
CT: control target
= control target key end

     0   :  { %8 = vsyncpa [#allocation3], 0  ;;  %s2039_s0 = inlined_call_operand.vmem [shape: bf16[16,8,128], index: 0, kind: input, shape index: {}]   ;;  %s2040_s1 = inlined_call_operand.vmem [shape: bf16[64,8], index: 1, kind: input, shape index: {}]   ;;  %s2041_s2 = inlined_call_operand.vmem [shape: f32[64,1], index: 2, kind: input, shape index: {}]   ;;  %s2042_s3 = inlined_call_operand.hbm [shape: f32[16,256], index: 3, kind: output, shape index: {}]  }
   0x1   :  { %10 = vsyncpa [#allocation3 + $0x1], 0  ;;  %s1508_s12 = smov 0   ;;  %s1510_s13 = smov 0  }
   0x2   :  { %s1512_s14 = smov 0   ;;  %s1514_s15 = smov 0  }
   0x3 LB: > { %s1529_s16 = sadd.s32 4294967295, %s1484_s15   ;;  %s1192_s17 = sadd.s32 4294967294, %s1484_s15   ;;  %s1484_s15 = sphi %s1514_s15, %s2048_s15   ;;  %s1480_s14 = sphi %s1512_s14, %s2047_s14   ;;  %s1476_s13 = sphi %s1510_s13, %s2046_s13   ;;  %s1472_s12 = sphi %s1508_s12, %s2045_s12  }
   0x4   : > { %s1533_s18 = sadd.s32 1, %s1484_s15   ;;  %s91_s19 = sadd.s32 1, %s1480_s14 }
   0x5   : > { %s88_s20 = ssub.s32 %s1484_s15, %s1533_s18  ;;  %p101_p0 = scmp.ne.s32.totalorder %s1480_s14, %s1476_s13 }
   0x6   : > { %p89_p1 = scmp.eq.s32.totalorder %s88_s20, 0  ;;  %p102_p2 = scmp.eq.s32.totalorder %s1529_s16, 1 }
   0x7   : > { %p107_p3 = scmp.ne.s32.totalorder %s1476_s13, %s1472_s12  ;;  %p108_p4 = scmp.eq.s32.totalorder %s1192_s17, 1 }
   0x8   : > { %s1544_s21 = scalar_select %p89_p1, %s1480_s14, %s91_s19  }
   0x9   : > { %p1546_p5 = por %p102_p2, %p101_p0  ;;  %p1550_p6 = por %p108_p4, %p107_p3 }
   0xa   : > { %p1195_p7 = scmp.ge.s32.totalorder %s1484_s15, 1  ;;  %p141_p8 = scmp.lt.s32.totalorder %s1484_s15, 3 }
   0xc   : > { %p142_p9 = pnand %p1195_p7, %p141_p8 }
   0xd   : > { %s1197_s24 = sshll.u32 (!%p142_p9), %s1529_s16, 3  ;;  %v1560_v0 = vld [vmem:[%s2040_s1] sm:$0xff] (!%p142_p9)   ;;  %vm249_vm0 = vcmask (!%p142_p9), 64512   ;;  %v182_v2 = vld [vmem:[%s2041_s2 + $0x10] sm:$0xff] (!%p142_p9)  ;;  %vm262_vm1 = vcmask (!%p142_p9), 1043456   ;;  %v1486_v3 = vmov (!%p142_p9), 0  }
   0xe   : > { %145 = sbr.rel (%p142_p9) target bundleno = 358 (0x166), region = 32  ;;  %p166_p10 = scmp.lt.s32.totalorder (!%p142_p9), %s1197_s24, 15  ;;  %1290 = vmatprep.mubr.msk.bf16.mxu0 (!%p142_p9), %vm249_vm0, %v1560_v0  ;;  %1300 = vmatprep.mubr.msk.bf16.mxu1 (!%p142_p9), %vm249_vm0, %v1560_v0  ;;  %v180_v1 = vld [vmem:[%s2041_s2] sm:$0xff] (!%p142_p9)  ;;  %v1580_v4 = vld [vmem:[%s2040_s1 + $0x8] sm:$0xff] (!%p142_p9)   ;;  %v183_v12 = vld [vmem:[%s2041_s2 + $0x18] sm:$0xff] (!%p142_p9) }
   0xf   : > { %1416 = vset.pattern.permute.xlu0 (!%p142_p9), %v1486_v3  ;;  %1417 = vset.pattern.permute.xlu1 (!%p142_p9), %v1486_v3  ;;  %v181_v11 = vld [vmem:[%s2041_s2 + $0x8] sm:$0xff] (!%p142_p9)  ;;  %v1420_v15 = vld [vmem:[%s2040_s1 + $0x10] sm:$0xff] (!%p142_p9)   ;;  %v184_v18 = vld [vmem:[%s2041_s2 + $0x20] sm:$0xff] (!%p142_p9)  ;;  %s1247_s11 = sshll.u32 (!%p142_p9), %s1529_s16, 8  ;;  %s1487_s26 = smov (!%p142_p9), [#allocation2]  }
  0x10   : > { %191 = vperm.xlu0 (!%p142_p9), %1416, %v180_v1   ;;  %201 = vperm.xlu1 (!%p142_p9), %1417, %v182_v2   ;;  %v185_v19 = vld [vmem:[%s2041_s2 + $0x28] sm:$0xff] (!%p142_p9)  ;;  %v1421_v20 = vld [vmem:[%s2040_s1 + $0x18] sm:$0xff] (!%p142_p9)   ;;  %v186_v21 = vld [vmem:[%s2041_s2 + $0x30] sm:$0xff] (!%p142_p9)  ;;  %s1426_s27 = sshll.u32 (!%p142_p9), %s1487_s26, 4  ;;  %s1427_s27 = int_to_ptr.vmem [resolvable:$false] %s1426_s27 }
  0x11   : > { %v187_v22 = vld [vmem:[%s2041_s2 + $0x38] sm:$0xff] (!%p142_p9)  ;;  %s1428_s28 = scalar_lea.vmem (!%p142_p9), %s1427_s27, 512 }
  0x14   : > { %196 = vperm.xlu0 (!%p142_p9), %1416, %v181_v11   ;;  %206 = vperm.xlu1 (!%p142_p9), %1417, %v183_v12  }
  0x15   : > { %s2050_s24 = smov (!%p166_p10, %s1197_s24), 15 }
  0x16   : > { %s1198_s4 = sshll.u32 %s2050_s24, 2  ;;  %s1993_s24 = scalar_lea.hbm %s2042_s3, %s1247_s11 }
  0x17   : > { %s1575_s7 = scalar_lea.vmem %s2039_s0, %s1198_s4 }
  0x18   : > { %v188_v5 = vld [vmem:[%s1575_s7] sm:$0xf]  ;;  %v1207_v6 = vld [vmem:[%s1575_s7 + $0x4] sm:$0xf]  ;;  %v1212_v7 = vld [vmem:[%s1575_s7 + $0x8] sm:$0xf]  ;;  %211 = vperm.xlu0 %1416, %v184_v18   ;;  %216 = vperm.xlu1 %1417, %v185_v19  }
  0x19   : > { %1368 = vmatprep.subr.msk.bf16.mxu0 %vm262_vm1, %v188_v5  ;;  %1369 = vmatprep.subr.msk.bf16.mxu1 %vm262_vm1, %v1207_v6  ;;  %v264_v8 = vsel %vm262_vm1, %v188_v5, 0  ;;  %v372_v9 = vsel %vm262_vm1, %v1207_v6, 0  ;;  %v1217_v10 = vld [vmem:[%s1575_s7 + $0xc] sm:$0xf]  ;;  %v479_v13 = vsel %vm262_vm1, %v1212_v7, 0 }
  0x1a   : > { %1289 = vmatpush3.bf16.msra.mxu0 %v264_v8  ;;  %1299 = vmatpush3.bf16.msra.mxu1 %v372_v9  ;;  %v586_v14 = vsel %vm262_vm1, %v1217_v10, 0  ;;  %v1222_v16 = vld [vmem:[%s1575_s7 + $0x10] sm:$0xf]  ;;  %v1227_v17 = vld [vmem:[%s1575_s7 + $0x14] sm:$0xf] }
  0x1b   : > { %1370 = vmatprep.subr.msk.bf16.mxu0 %vm262_vm1, %v1212_v7  ;;  %1371 = vmatprep.subr.msk.bf16.mxu1 %vm262_vm1, %v1217_v10  ;;  %v693_v23 = vsel %vm262_vm1, %v1222_v16, 0  ;;  %v800_v24 = vsel %vm262_vm1, %v1227_v17, 0  ;;  %v1232_v25 = vld [vmem:[%s1575_s7 + $0x18] sm:$0xf]  ;;  %v1237_v26 = vld [vmem:[%s1575_s7 + $0x1c] sm:$0xf] }
  0x1c   : > { %221 = vperm.xlu0 %1416, %v186_v21   ;;  %226 = vperm.xlu1 %1417, %v187_v22   ;;  %v907_v27 = vsel %vm262_vm1, %v1232_v25, 0  ;;  %v1014_v28 = vsel %vm262_vm1, %v1237_v26, 0  ;;  %s162_s7 = sand.u32 1, %s1476_s13  }
  0x1d   : > { %1291 = vmatmul.mubr.msk.bf16.vlgmr.msra.gmra.mrb[0].mxu0 %vm249_vm0, %v1580_v4  ;;  %1301 = vmatmul.mubr.msk.bf16.vlgmr.msra.gmra.mrb[0].mxu1 %vm249_vm0, %v1580_v4  ;;  %s1768_s9 = sshll.u32 %s162_s7, 4  ;;  %s1119_s16 = scalar_lea.sflag [#allocation3], %s162_s7 }
  0x1e   : > { %1309 = vmatpush3.bf16.msra.mxu0 %v479_v13  ;;  %1319 = vmatpush3.bf16.msra.mxu1 %v586_v14  ;;  %s1785_s10 = scalar_lea.vmem [#allocation2], %s1768_s9 }
  0x1f   : > { %1294 = vmatprep.mubr.msk.bf16.mxu0 %vm249_vm0, %v1420_v15  ;;  %1304 = vmatprep.mubr.msk.bf16.mxu1 %vm249_vm0, %v1420_v15  ;;  %s1133_s17 = sshll.u32 %s1785_s10, 4  ;;  %s1995_s17 = int_to_ptr.vmem [resolvable:$true] %s1133_s17 }
  0x20   : > { %1372 = vmatprep.subr.msk.bf16.mxu0 %vm262_vm1, %v1222_v16  ;;  %1373 = vmatprep.subr.msk.bf16.mxu1 %vm262_vm1, %v1227_v17  ;;  %s1422_s25 = scalar_lea.vmem %s1995_s17, 256  ;;  %p1429_p0 = scmp.lt.s32.totalorder %s1995_s17, %s1427_s27 }
  0x21   : > { %p1423_p11 = scmp.ne.s32.totalorder %s1995_s17, %s1422_s25  ;;  %p1430_p1 = scmp.lt.s32.totalorder %s1428_s28, %s1422_s25 }
  0x23   : > { %p1424_p12 = pnand %p1423_p11, %p1546_p5  ;;  %p1431_p2 = por %p1430_p1, %p1429_p0 }
  0x25   : > { %1295 = vmatmul.mubr.msk.bf16.gmra.mrb[4].mxu0 %vm249_vm0, %v1421_v20  ;;  %1305 = vmatmul.mubr.msk.bf16.gmra.mrb[4].mxu1 %vm249_vm0, %v1421_v20  ;;  %p1425_p13 = pneg %p1424_p12 }
  0x26   : > { %1310 = vmatprep.mubr.msk.bf16.mxu0 %vm249_vm0, %v1560_v0  ;;  %1320 = vmatprep.mubr.msk.bf16.mxu1 %vm249_vm0, %v1560_v0 }
  0x27   : > { %p1432_p3 = pnand %p1431_p2, %p1425_p13 }
  0x2d   : > { %1311 = vmatmul.mubr.msk.bf16.vlgmr.msra.gmra.mrb[8].mxu0 %vm249_vm0, %v1580_v4  ;;  %1321 = vmatmul.mubr.msk.bf16.vlgmr.msra.gmra.mrb[8].mxu1 %vm249_vm0, %v1580_v4 }
  0x2e   : > { %1329 = vmatpush3.bf16.msra.mxu0 %v693_v23  ;;  %1339 = vmatpush3.bf16.msra.mxu1 %v800_v24 }
  0x2f   : > { %1314 = vmatprep.mubr.msk.bf16.mxu0 %vm249_vm0, %v1420_v15  ;;  %1324 = vmatprep.mubr.msk.bf16.mxu1 %vm249_vm0, %v1420_v15 }
  0x30   : > { %1374 = vmatprep.subr.msk.bf16.mxu0 %vm262_vm1, %v1232_v25  ;;  %1375 = vmatprep.subr.msk.bf16.mxu1 %vm262_vm1, %v1237_v26 }
  0x35   : > { %1315 = vmatmul.mubr.msk.bf16.gmra.mrb[12].mxu0 %vm249_vm0, %v1421_v20  ;;  %1325 = vmatmul.mubr.msk.bf16.gmra.mrb[12].mxu1 %vm249_vm0, %v1421_v20 }
  0x36   : > { %1330 = vmatprep.mubr.msk.bf16.mxu0 %vm249_vm0, %v1560_v0  ;;  %1340 = vmatprep.mubr.msk.bf16.mxu1 %vm249_vm0, %v1560_v0 }
  0x3d   : > { %1331 = vmatmul.mubr.msk.bf16.vlgmr.msra.gmra.mrb[16].mxu0 %vm249_vm0, %v1580_v4  ;;  %1341 = vmatmul.mubr.msk.bf16.vlgmr.msra.gmra.mrb[16].mxu1 %vm249_vm0, %v1580_v4 }
  0x3e   : > { %1349 = vmatpush3.bf16.msra.mxu0 %v907_v27  ;;  %1359 = vmatpush3.bf16.msra.mxu1 %v1014_v28 }
  0x3f   : > { %1334 = vmatprep.mubr.msk.bf16.mxu0 %vm249_vm0, %v1420_v15  ;;  %1344 = vmatprep.mubr.msk.bf16.mxu1 %vm249_vm0, %v1420_v15 }
  0x45   : > { %1335 = vmatmul.mubr.msk.bf16.gmra.mrb[20].mxu0 %vm249_vm0, %v1421_v20  ;;  %1345 = vmatmul.mubr.msk.bf16.gmra.mrb[20].mxu1 %vm249_vm0, %v1421_v20 }
  0x46   : > { %1350 = vmatprep.mubr.msk.bf16.mxu0 %vm249_vm0, %v1560_v0  ;;  %1360 = vmatprep.mubr.msk.bf16.mxu1 %vm249_vm0, %v1560_v0 }
  0x4d   : > { %1351 = vmatmul.mubr.msk.bf16.vlgmr.msra.gmra.mrb[24].mxu0 %vm249_vm0, %v1580_v4  ;;  %1361 = vmatmul.mubr.msk.bf16.vlgmr.msra.gmra.mrb[24].mxu1 %vm249_vm0, %v1580_v4 }
  0x4e   : > { %1354 = vmatprep.mubr.msk.bf16.mxu0 %vm249_vm0, %v1420_v15  ;;  %1364 = vmatprep.mubr.msk.bf16.mxu1 %vm249_vm0, %v1420_v15 }
  0x55   : > { %1355 = vmatmul.mubr.msk.bf16.gmra.mrb[28].mxu0 %vm249_vm0, %v1421_v20  ;;  %1365 = vmatmul.mubr.msk.bf16.gmra.mrb[28].mxu1 %vm249_vm0, %v1421_v20 }
  0x8f   : > { %v1674_v29 = vpop.permute.xlu0 %191  ;;  %v1676_v30 = vpop.permute.xlu1 %201 }
  0x93   : > { %v1678_v31 = vpop.permute.xlu0 %196  ;;  %v1680_v32 = vpop.permute.xlu1 %206 }
  0x97   : > { %v1682_v33 = vpop.permute.xlu0 %211  ;;  %v1684_v34 = vpop.permute.xlu1 %216 }
  0x9b   : > { %v1700_v55 = vpop.permute.xlu0 %221  ;;  %v1702_v56 = vpop.permute.xlu1 %226 }
  0xf0   : > { %v1292_v35 = vpop.f32.mrb[0].mxu0  ;;  %v1302_v36 = vpop.f32.mrb[0].mxu1 }
  0xf1   : > { %v300_v37 = vpop.f32.mrb[1].mxu0  ;;  %v408_v38 = vpop.f32.mrb[1].mxu1  ;;  %v309_v45 = vadd.f32 %v1292_v35, %v1676_v30  ;;  %v417_v46 = vadd.f32 %v1302_v36, %v1676_v30 }
  0xf2   : > { %v301_v39 = vadd.f32 %v300_v37, %v1674_v29  ;;  %v409_v40 = vadd.f32 %v408_v38, %v1674_v29  ;;  %v1293_v41 = vpop.f32.mrb[2].mxu0  ;;  %v1303_v42 = vpop.f32.mrb[2].mxu1 }
  0xf3   : > { %v303_v43 = vpop.f32.mrb[3].mxu0  ;;  %v411_v44 = vpop.f32.mrb[3].mxu1  ;;  %v312_v49 = vadd.f32 %v1293_v41, %v1680_v32  ;;  %v420_v50 = vadd.f32 %v1303_v42, %v1680_v32  ;;  %v333_v57 = vmax.f32 %v309_v45, 0.0  ;;  %v441_v58 = vmax.f32 %v417_v46, 0.0 }
  0xf4   : > { %v1691_v47 = vadd.f32 %v303_v43, %v1678_v31  ;;  %v1694_v48 = vadd.f32 %v411_v44, %v1678_v31  ;;  %v331_v51 = vmax.f32 %v301_v39, 0.0  ;;  %v439_v52 = vmax.f32 %v409_v40, 0.0 }
  0xf5   : > { %v334_v63 = vmax.f32 %v312_v49, 0.0  ;;  %v442_v0 = vmax.f32 %v420_v50, 0.0 }
  0xf6   : > { %v332_v53 = vmax.f32 %v1691_v47, 0.0  ;;  %v440_v54 = vmax.f32 %v1694_v48, 0.0 }
  0xf8   : > { %v339_v59 = vadd.f32 %v332_v53, %v331_v51  ;;  %v447_v60 = vadd.f32 %v440_v54, %v439_v52  ;;  %v1296_v61 = vpop.f32.mrb[4].mxu0  ;;  %v1306_v62 = vpop.f32.mrb[4].mxu1 }
  0xf9   : > { %v325_v1 = vadd.f32 %v1296_v61, %v1700_v55  ;;  %v433_v2 = vadd.f32 %v1306_v62, %v1700_v55  ;;  %v316_v3 = vpop.f32.mrb[5].mxu0  ;;  %v424_v4 = vpop.f32.mrb[5].mxu1 }
  0xfa   : > { %v340_v5 = vadd.f32 %v339_v59, %v333_v57  ;;  %v448_v6 = vadd.f32 %v447_v60, %v441_v58  ;;  %v317_v7 = vadd.f32 %v316_v3, %v1682_v33  ;;  %v425_v8 = vadd.f32 %v424_v4, %v1682_v33  ;;  %v1297_v9 = vpop.f32.mrb[6].mxu0  ;;  %v1307_v10 = vpop.f32.mrb[6].mxu1 }
  0xfb   : > { %v337_v11 = vmax.f32 %v325_v1, 0.0  ;;  %v445_v12 = vmax.f32 %v433_v2, 0.0  ;;  %v328_v13 = vadd.f32 %v1297_v9, %v1702_v56  ;;  %v436_v14 = vadd.f32 %v1307_v10, %v1702_v56  ;;  %v319_v15 = vpop.f32.mrb[7].mxu0  ;;  %v427_v16 = vpop.f32.mrb[7].mxu1 }
  0xfc   : > { %v335_v17 = vmax.f32 %v317_v7, 0.0  ;;  %v341_v18 = vadd.f32 %v340_v5, %v334_v63  ;;  %v443_v19 = vmax.f32 %v425_v8, 0.0  ;;  %v449_v20 = vadd.f32 %v448_v6, %v442_v0 }
  0xfd   : > { %v356_v21 = vmax.f32 %v333_v57, %v337_v11  ;;  %v463_v22 = vmax.f32 %v441_v58, %v445_v12  ;;  %v338_v23 = vmax.f32 %v328_v13, 0.0  ;;  %v446_v24 = vmax.f32 %v436_v14, 0.0 }
  0xfe   : > { %v342_v25 = vadd.f32 %v341_v18, %v335_v17  ;;  %v354_v26 = vmax.f32 %v331_v51, %v335_v17  ;;  %v450_v27 = vadd.f32 %v449_v20, %v443_v19  ;;  %v461_v28 = vmax.f32 %v439_v52, %v443_v19 }
  0xff   : > { %v357_v35 = vmax.f32 %v334_v63, %v338_v23  ;;  %v464_v36 = vmax.f32 %v442_v0, %v446_v24  ;;  %v320_v37 = vadd.f32 %v319_v15, %v1684_v34  ;;  %v428_v38 = vadd.f32 %v427_v16, %v1684_v34 }
 0x100   : > { %v1312_v39 = vpop.f32.mrb[8].mxu0  ;;  %v1322_v40 = vpop.f32.mrb[8].mxu1 }
 0x101   : > { %v359_v41 = vmax.f32 %v356_v21, %v357_v35  ;;  %v466_v42 = vmax.f32 %v463_v22, %v464_v36  ;;  %v336_v43 = vmax.f32 %v320_v37, 0.0  ;;  %v444_v44 = vmax.f32 %v428_v38, 0.0  ;;  %v515_v45 = vpop.f32.mrb[9].mxu0  ;;  %v622_v46 = vpop.f32.mrb[9].mxu1 }
 0x102   : > { %v524_v47 = vadd.f32 %v1312_v39, %v1676_v30  ;;  %v631_v48 = vadd.f32 %v1322_v40, %v1676_v30  ;;  %v1715_v49 = vadd.f32 %v515_v45, %v1674_v29  ;;  %v1718_v50 = vadd.f32 %v622_v46, %v1674_v29  ;;  %v1313_v51 = vpop.f32.mrb[10].mxu0  ;;  %v1323_v52 = vpop.f32.mrb[10].mxu1 }
 0x103   : > { %v343_v57 = vadd.f32 %v342_v25, %v336_v43  ;;  %v355_v58 = vmax.f32 %v332_v53, %v336_v43  ;;  %v451_v59 = vadd.f32 %v450_v27, %v444_v44  ;;  %v462_v60 = vmax.f32 %v440_v54, %v444_v44  ;;  %v518_v61 = vpop.f32.mrb[11].mxu0  ;;  %v625_v62 = vpop.f32.mrb[11].mxu1 }
 0x104   : > { %v548_v63 = vmax.f32 %v524_v47, 0.0  ;;  %v655_v0 = vmax.f32 %v631_v48, 0.0  ;;  %v546_v1 = vmax.f32 %v1715_v49, 0.0  ;;  %v653_v2 = vmax.f32 %v1718_v50, 0.0 }
 0x105   : > { %v344_v3 = vadd.f32 %v343_v57, %v337_v11  ;;  %v358_v4 = vmax.f32 %v354_v26, %v355_v58  ;;  %v452_v5 = vadd.f32 %v451_v59, %v445_v12  ;;  %v465_v6 = vmax.f32 %v461_v28, %v462_v60 }
 0x106   : > { %v1723_v7 = vadd.f32 %v1313_v51, %v1680_v32  ;;  %v1726_v8 = vadd.f32 %v1323_v52, %v1680_v32  ;;  %v1729_v53 = vadd.f32 %v518_v61, %v1678_v31  ;;  %v1732_v54 = vadd.f32 %v625_v62, %v1678_v31 }
 0x107   : > { %v345_v9 = vadd.f32 %v344_v3, %v338_v23  ;;  %v360_v10 = vmax.f32 %v358_v4, %v359_v41  ;;  %v453_v13 = vadd.f32 %v452_v5, %v446_v24  ;;  %v467_v14 = vmax.f32 %v465_v6, %v466_v42 }
 0x108   : > { %v549_v11 = vmax.f32 %v1723_v7, 0.0  ;;  %v656_v12 = vmax.f32 %v1726_v8, 0.0  ;;  %v547_v15 = vmax.f32 %v1729_v53, 0.0  ;;  %v654_v16 = vmax.f32 %v1732_v54, 0.0  ;;  %v1316_v17 = vpop.f32.mrb[12].mxu0  ;;  %v1326_v18 = vpop.f32.mrb[12].mxu1 }
 0x109   : > { %v346_v19 = vrot.slane %v345_v9, 4  ;;  %v361_v20 = vrot.slane %v360_v10, 4  ;;  %v454_v21 = vrot.slane %v453_v13, 4  ;;  %v468_v22 = vrot.slane %v467_v14, 4  ;;  %v531_v25 = vpop.f32.mrb[13].mxu0  ;;  %v638_v23 = vpop.f32.mrb[13].mxu1 }
 0x10a   : > { %v554_v24 = vadd.f32 %v547_v15, %v546_v1  ;;  %v661_v26 = vadd.f32 %v654_v16, %v653_v2  ;;  %v1747_v27 = vadd.f32 %v1316_v17, %v1700_v55  ;;  %v1750_v28 = vadd.f32 %v1326_v18, %v1700_v55  ;;  %v1317_v35 = vpop.f32.mrb[14].mxu0  ;;  %v1327_v36 = vpop.f32.mrb[14].mxu1 }
 0x10b   : > { %v347_v37 = vadd.f32 %v346_v19, %v345_v9  ;;  %v362_v38 = vmax.f32 %v360_v10, %v361_v20  ;;  %v455_v39 = vadd.f32 %v454_v21, %v453_v13  ;;  %v469_v40 = vmax.f32 %v467_v14, %v468_v22  ;;  %v534_v41 = vpop.f32.mrb[15].mxu0  ;;  %v641_v42 = vpop.f32.mrb[15].mxu1 }
 0x10c   : > { %v555_v43 = vadd.f32 %v554_v24, %v548_v63  ;;  %v662_v44 = vadd.f32 %v661_v26, %v655_v0  ;;  %v552_v45 = vmax.f32 %v1747_v27, 0.0  ;;  %v659_v46 = vmax.f32 %v1750_v28, 0.0 }
 0x10d   : > { %v348_v47 = vrot.slane %v347_v37, 2  ;;  %v363_v48 = vrot.slane %v362_v38, 2  ;;  %v456_v51 = vrot.slane %v455_v39, 2  ;;  %v470_v52 = vrot.slane %v469_v40, 2 }
 0x10e   : > { %v1757_v57 = vmax.f32 %v548_v63, %v552_v45  ;;  %v1761_v58 = vmax.f32 %v655_v0, %v659_v46  ;;  %v532_v59 = vadd.f32 %v531_v25, %v1682_v33  ;;  %v556_v60 = vadd.f32 %v555_v43, %v549_v11 }
 0x10f   : > { %v349_v61 = vadd.f32 %v348_v47, %v347_v37  ;;  %v364_v62 = vmax.f32 %v362_v38, %v363_v48  ;;  %v457_v3 = vadd.f32 %v456_v51, %v455_v39  ;;  %v471_v4 = vmax.f32 %v469_v40, %v470_v52 }
 0x110   : > { %v550_v5 = vmax.f32 %v532_v59, 0.0  ;;  %v639_v63 = vadd.f32 %v638_v23, %v1682_v33  ;;  %v663_v6 = vadd.f32 %v662_v44, %v656_v12  ;;  %v1774_v0 = vadd.f32 %v1317_v35, %v1702_v56  ;;  %v1332_v9 = vpop.f32.mrb[16].mxu0  ;;  %v1342_v10 = vpop.f32.mrb[16].mxu1 }
 0x111   : > { %v350_v13 = vrot.slane %v349_v61, 1  ;;  %v365_v14 = vrot.slane %v364_v62, 1  ;;  %v458_v17 = vrot.slane %v457_v3, 1  ;;  %v472_v18 = vrot.slane %v471_v4, 1  ;;  %v729_v19 = vpop.f32.mrb[17].mxu0  ;;  %v836_v20 = vpop.f32.mrb[17].mxu1 }
 0x112   : > { %v557_v21 = vadd.f32 %v556_v60, %v550_v5  ;;  %v568_v22 = vmax.f32 %v546_v1, %v550_v5  ;;  %v657_v25 = vmax.f32 %v639_v63, 0.0  ;;  %v553_v23 = vmax.f32 %v1774_v0, 0.0  ;;  %v1333_v24 = vpop.f32.mrb[18].mxu0  ;;  %v1343_v26 = vpop.f32.mrb[18].mxu1 }
 0x113   : > { %v351_v35 = vadd.f32 %v350_v13, %v349_v61  ;;  %v366_v37 = vmax.f32 %v364_v62, %v365_v14  ;;  %v459_v38 = vadd.f32 %v458_v17, %v457_v3  ;;  %v473_v39 = vmax.f32 %v471_v4, %v472_v18  ;;  %v732_v40 = vpop.f32.mrb[19].mxu0  ;;  %v839_v43 = vpop.f32.mrb[19].mxu1 }
 0x114   : > { %v664_v44 = vadd.f32 %v663_v6, %v657_v25  ;;  %v675_v47 = vmax.f32 %v653_v2, %v657_v25  ;;  %v571_v49 = vmax.f32 %v549_v11, %v553_v23  ;;  %v650_v1 = vadd.f32 %v1327_v36, %v1702_v56 }
 0x115   : > { %v353_v48 = vmul.f32 0.015625, %v351_v35  ;;  %368 = vst [vmem:[%s1785_s10 + $0x8] sm:$0x1] %v366_v37  ;;  %v460_v51 = vmul.f32 0.015625, %v459_v38  ;;  %475 = vst [vmem:[%s1785_s10 + $0x9] sm:$0x1] %v473_v39  ;;  %v535_v52 = vadd.f32 %v534_v41, %v1684_v34  ;;  %v642_v50 = vadd.f32 %v641_v42, %v1684_v34 }
 0x116   : > { %v573_v2 = vmax.f32 %v1757_v57, %v571_v49  ;;  %v660_v7 = vmax.f32 %v650_v1, 0.0  ;;  %v738_v11 = vadd.f32 %v1332_v9, %v1676_v30  ;;  %v1794_v36 = vadd.f32 %v1342_v10, %v1676_v30 }
 0x117   : > { %367 = vst [vmem:[%s1785_s10] sm:$0x1] %v353_v48  ;;  %474 = vst [vmem:[%s1785_s10 + $0x1] sm:$0x1] %v460_v51  ;;  %v551_v59 = vmax.f32 %v535_v52, 0.0  ;;  %v658_v60 = vmax.f32 %v642_v50, 0.0  ;;  %v1799_v61 = vadd.f32 %v729_v19, %v1674_v29  ;;  %v1802_v62 = vadd.f32 %v836_v20, %v1674_v29 }
 0x118   : > { %v678_v41 = vmax.f32 %v656_v12, %v660_v7  ;;  %v762_v42 = vmax.f32 %v738_v11, 0.0  ;;  %v869_v57 = vmax.f32 %v1794_v36, 0.0  ;;  %v1808_v3 = vadd.f32 %v1333_v24, %v1680_v32  ;;  %v1336_v4 = vpop.f32.mrb[20].mxu0  ;;  %v1346_v5 = vpop.f32.mrb[20].mxu1 }
 0x119   : > { %v558_v63 = vadd.f32 %v557_v21, %v551_v59  ;;  %v569_v6 = vmax.f32 %v547_v15, %v551_v59  ;;  %v665_v0 = vadd.f32 %v664_v44, %v658_v60  ;;  %v676_v9 = vmax.f32 %v654_v16, %v658_v60  ;;  %v745_v10 = vpop.f32.mrb[21].mxu0  ;;  %v852_v13 = vpop.f32.mrb[21].mxu1 }
 0x11a   : > { %v680_v8 = vmax.f32 %v1761_v58, %v678_v41  ;;  %v760_v12 = vmax.f32 %v1799_v61, 0.0  ;;  %v867_v14 = vmax.f32 %v1802_v62, 0.0  ;;  %v763_v17 = vmax.f32 %v1808_v3, 0.0  ;;  %v1818_v18 = vpop.f32.mrb[22].mxu0  ;;  %v1820_v19 = vpop.f32.mrb[22].mxu1 }
 0x11b   : > { %v559_v53 = vadd.f32 %v558_v63, %v552_v45  ;;  %v572_v15 = vmax.f32 %v568_v22, %v569_v6  ;;  %v666_v54 = vadd.f32 %v665_v0, %v659_v46  ;;  %v679_v16 = vmax.f32 %v675_v47, %v676_v9  ;;  %v1826_v20 = vpop.f32.mrb[23].mxu0  ;;  %v1828_v58 = vpop.f32.mrb[23].mxu1 }
 0x11c   : > { %v1831_v21 = vadd.f32 %v1343_v26, %v1680_v32  ;;  %v1834_v25 = vadd.f32 %v732_v40, %v1678_v31  ;;  %v1837_v24 = vadd.f32 %v839_v43, %v1678_v31  ;;  %v1840_v27 = vadd.f32 %v1336_v4, %v1700_v55 }
 0x11d   : > { %v560_v45 = vadd.f32 %v559_v53, %v553_v23  ;;  %v574_v28 = vmax.f32 %v572_v15, %v573_v2  ;;  %v667_v46 = vadd.f32 %v666_v54, %v660_v7  ;;  %v681_v22 = vmax.f32 %v679_v16, %v680_v8 }
 0x11e   : > { %v870_v35 = vmax.f32 %v1831_v21, 0.0  ;;  %v761_v37 = vmax.f32 %v1834_v25, 0.0  ;;  %v868_v26 = vmax.f32 %v1837_v24, 0.0  ;;  %v766_v38 = vmax.f32 %v1840_v27, 0.0 }
 0x11f   : > { %v561_v39 = vrot.slane %v560_v45, 4  ;;  %v575_v40 = vrot.slane %v574_v28, 4  ;;  %v668_v44 = vrot.slane %v667_v46, 4  ;;  %v682_v43 = vrot.slane %v681_v22, 4 }
 0x120   : > { %v768_v47 = vadd.f32 %v761_v37, %v760_v12  ;;  %v875_v23 = vadd.f32 %v868_v26, %v867_v14  ;;  %v1854_v49 = vmax.f32 %v762_v42, %v766_v38  ;;  %v1857_v1 = vadd.f32 %v1346_v5, %v1700_v55  ;;  %v1352_v48 = vpop.f32.mrb[24].mxu0  ;;  %v1362_v51 = vpop.f32.mrb[24].mxu1 }
 0x121   : > { %v562_v52 = vadd.f32 %v561_v39, %v560_v45  ;;  %v576_v50 = vmax.f32 %v574_v28, %v575_v40  ;;  %v669_v2 = vadd.f32 %v668_v44, %v667_v46  ;;  %v683_v7 = vmax.f32 %v681_v22, %v682_v43  ;;  %v1859_v11 = vpop.f32.mrb[25].mxu0  ;;  %v1861_v36 = vpop.f32.mrb[25].mxu1 }
 0x122   : > { %v769_v59 = vadd.f32 %v768_v47, %v762_v42  ;;  %v876_v60 = vadd.f32 %v875_v23, %v869_v57  ;;  %v873_v61 = vmax.f32 %v1857_v1, 0.0  ;;  %v746_v41 = vadd.f32 %v745_v10, %v1682_v33  ;;  %v1865_v4 = vpop.f32.mrb[26].mxu0  ;;  %v1867_v5 = vpop.f32.mrb[26].mxu1 }
 0x123   : > { %v563_v63 = vrot.slane %v562_v52, 2  ;;  %v577_v6 = vrot.slane %v576_v50, 2  ;;  %v670_v0 = vrot.slane %v669_v2, 2  ;;  %v684_v9 = vrot.slane %v683_v7, 2  ;;  %v1869_v8 = vpop.f32.mrb[27].mxu0  ;;  %v1871_v53 = vpop.f32.mrb[27].mxu1 }
 0x124   : > { %v1875_v42 = vmax.f32 %v869_v57, %v873_v61  ;;  %v764_v15 = vmax.f32 %v746_v41, 0.0  ;;  %v770_v10 = vadd.f32 %v769_v59, %v763_v17  ;;  %v853_v54 = vadd.f32 %v852_v13, %v1682_v33 }
 0x125   : > { %v564_v16 = vadd.f32 %v563_v63, %v562_v52  ;;  %v578_v45 = vmax.f32 %v576_v50, %v577_v6  ;;  %v671_v28 = vadd.f32 %v670_v0, %v669_v2  ;;  %v685_v46 = vmax.f32 %v683_v7, %v684_v9 }
 0x126   : > { %v771_v22 = vadd.f32 %v770_v10, %v764_v15  ;;  %v782_v39 = vmax.f32 %v760_v12, %v764_v15  ;;  %v871_v40 = vmax.f32 %v853_v54, 0.0  ;;  %v877_v44 = vadd.f32 %v876_v60, %v870_v35 }
 0x127   : > { %v565_v43 = vrot.slane %v564_v16, 1  ;;  %v579_v47 = vrot.slane %v578_v45, 1  ;;  %v672_v57 = vrot.slane %v671_v28, 1  ;;  %v686_v23 = vrot.slane %v685_v46, 1 }
 0x128   : > { %v878_v41 = vadd.f32 %v877_v44, %v871_v40  ;;  %v889_v59 = vmax.f32 %v867_v14, %v871_v40  ;;  %v757_v13 = vadd.f32 %v1818_v18, %v1702_v56  ;;  %v864_v52 = vadd.f32 %v1820_v19, %v1702_v56  ;;  %v1356_v12 = vpop.f32.mrb[28].mxu0  ;;  %v1366_v50 = vpop.f32.mrb[28].mxu1 }
 0x129   : > { %v566_v2 = vadd.f32 %v565_v43, %v564_v16  ;;  %v580_v7 = vmax.f32 %v578_v45, %v579_v47  ;;  %v673_v60 = vadd.f32 %v672_v57, %v671_v28  ;;  %v687_v63 = vmax.f32 %v685_v46, %v686_v23  ;;  %v1888_v6 = vpop.f32.mrb[29].mxu0  ;;  %v1890_v0 = vpop.f32.mrb[29].mxu1 }
 0x12a   : > { %v767_v62 = vmax.f32 %v757_v13, 0.0  ;;  %v874_v14 = vmax.f32 %v864_v52, 0.0  ;;  %v749_v18 = vadd.f32 %v1826_v20, %v1684_v34  ;;  %v856_v19 = vadd.f32 %v1828_v58, %v1684_v34  ;;  %v1896_v9 = vpop.f32.mrb[30].mxu0  ;;  %v1898_v15 = vpop.f32.mrb[30].mxu1 }
 0x12b   : > { %v567_v10 = vmul.f32 0.015625, %v566_v2  ;;  %582 = vst [vmem:[%s1785_s10 + $0xa] sm:$0x1] %v580_v7  ;;  %v674_v54 = vmul.f32 0.015625, %v673_v60  ;;  %689 = vst [vmem:[%s1785_s10 + $0xb] sm:$0x1] %v687_v63  ;;  %v952_v16 = vadd.f32 %v1352_v48, %v1676_v30  ;;  %v1059_v45 = vadd.f32 %v1362_v51, %v1676_v30 }
 0x12c   : > { %v1904_v28 = vpop.f32.mrb[31].mxu0  ;;  %v1906_v20 = vpop.f32.mrb[31].mxu1  ;;  %v785_v58 = vmax.f32 %v763_v17, %v767_v62  ;;  %v892_v46 = vmax.f32 %v870_v35, %v874_v14  ;;  %v765_v40 = vmax.f32 %v749_v18, 0.0  ;;  %v872_v44 = vmax.f32 %v856_v19, 0.0 }
 0x12d   : > { %581 = vst [vmem:[%s1785_s10 + $0x2] sm:$0x1] %v567_v10  ;;  %688 = vst [vmem:[%s1785_s10 + $0x3] sm:$0x1] %v674_v54  ;;  %v976_v43 = vmax.f32 %v952_v16, 0.0  ;;  %v1083_v47 = vmax.f32 %v1059_v45, 0.0  ;;  %v1916_v48 = vadd.f32 %v1859_v11, %v1674_v29  ;;  %v1920_v30 = vadd.f32 %v1861_v36, %v1674_v29 }
 0x12e   : > { %v787_v3 = vmax.f32 %v1854_v49, %v785_v58  ;;  %v894_v17 = vmax.f32 %v1875_v42, %v892_v46  ;;  %v772_v21 = vadd.f32 %v771_v22, %v765_v40  ;;  %v783_v35 = vmax.f32 %v761_v37, %v765_v40 }
 0x12f   : > { %v879_v51 = vadd.f32 %v878_v41, %v872_v44  ;;  %v890_v57 = vmax.f32 %v868_v26, %v872_v44  ;;  %v974_v23 = vmax.f32 %v1916_v48, 0.0  ;;  %v1081_v11 = vmax.f32 %v1920_v30, 0.0 }
 0x130   : > { %v773_v29 = vadd.f32 %v772_v21, %v766_v38  ;;  %v786_v36 = vmax.f32 %v782_v39, %v783_v35  ;;  %v1934_v49 = vadd.f32 %v1865_v4, %v1680_v32  ;;  %v1938_v25 = vadd.f32 %v1867_v5, %v1680_v32 }
 0x131   : > { %v880_v24 = vadd.f32 %v879_v51, %v873_v61  ;;  %v893_v37 = vmax.f32 %v889_v59, %v890_v57  ;;  %v1944_v26 = vadd.f32 %v1869_v8, %v1678_v31  ;;  %v1948_v27 = vadd.f32 %v1871_v53, %v1678_v31 }
 0x132   : > { %v774_v38 = vadd.f32 %v773_v29, %v767_v62  ;;  %v788_v42 = vmax.f32 %v786_v36, %v787_v3  ;;  %v977_v4 = vmax.f32 %v1934_v49, 0.0  ;;  %v1084_v22 = vmax.f32 %v1938_v25, 0.0 }
 0x133   : > { %v881_v32 = vadd.f32 %v880_v24, %v874_v14  ;;  %v895_v5 = vmax.f32 %v893_v37, %v894_v17  ;;  %v975_v1 = vmax.f32 %v1944_v26, 0.0  ;;  %v1082_v61 = vmax.f32 %v1948_v27, 0.0 }
 0x134   : > { %v775_v39 = vrot.slane %v774_v38, 4  ;;  %v789_v41 = vrot.slane %v788_v42, 4  ;;  %v1955_v8 = vadd.f32 %v1356_v12, %v1700_v55  ;;  %v1958_v31 = vadd.f32 %v1366_v50, %v1700_v55 }
 0x135   : > { %v882_v53 = vrot.slane %v881_v32, 4  ;;  %v896_v59 = vrot.slane %v895_v5, 4  ;;  %v982_v13 = vadd.f32 %v975_v1, %v974_v23  ;;  %v1089_v52 = vadd.f32 %v1082_v61, %v1081_v11 }
 0x136   : > { %v776_v2 = vadd.f32 %v775_v39, %v774_v38  ;;  %v790_v7 = vmax.f32 %v788_v42, %v789_v41  ;;  %v980_v60 = vmax.f32 %v1955_v8, 0.0  ;;  %v1087_v63 = vmax.f32 %v1958_v31, 0.0 }
 0x137   : > { %v883_v62 = vadd.f32 %v882_v53, %v881_v32  ;;  %v897_v12 = vmax.f32 %v895_v5, %v896_v59  ;;  %v983_v14 = vadd.f32 %v982_v13, %v976_v43  ;;  %v1090_v18 = vadd.f32 %v1089_v52, %v1083_v47 }
 0x138   : > { %v777_v55 = vrot.slane %v776_v2, 2  ;;  %v791_v50 = vrot.slane %v790_v7, 2  ;;  %v998_v19 = vmax.f32 %v976_v43, %v980_v60  ;;  %v1105_v10 = vmax.f32 %v1083_v47, %v1087_v63 }
 0x139   : > { %v884_v54 = vrot.slane %v883_v62, 2  ;;  %v898_v16 = vrot.slane %v897_v12, 2  ;;  %v960_v45 = vadd.f32 %v1888_v6, %v1682_v33  ;;  %v984_v58 = vadd.f32 %v983_v14, %v977_v4 }
 0x13a   : > { %v778_v46 = vadd.f32 %v777_v55, %v776_v2  ;;  %v792_v40 = vmax.f32 %v790_v7, %v791_v50  ;;  %v1067_v44 = vadd.f32 %v1890_v0, %v1682_v33  ;;  %v1091_v48 = vadd.f32 %v1090_v18, %v1084_v22 }
 0x13b   : > { %v885_v30 = vadd.f32 %v884_v54, %v883_v62  ;;  %v899_v3 = vmax.f32 %v897_v12, %v898_v16  ;;  %v978_v17 = vmax.f32 %v960_v45, 0.0  ;;  %v971_v21 = vadd.f32 %v1896_v9, %v1702_v56 }
 0x13c   : > { %v779_v43 = vrot.slane %v778_v46, 1  ;;  %v793_v47 = vrot.slane %v792_v40, 1  ;;  %v1085_v35 = vmax.f32 %v1067_v44, 0.0  ;;  %v1078_v6 = vadd.f32 %v1898_v15, %v1702_v56 }
 0x13d   : > { %v886_v51 = vrot.slane %v885_v30, 1  ;;  %v900_v57 = vrot.slane %v899_v3, 1  ;;  %v985_v29 = vadd.f32 %v984_v58, %v978_v17  ;;  %v996_v36 = vmax.f32 %v974_v23, %v978_v17 }
 0x13e   : > { %v780_v33 = vadd.f32 %v779_v43, %v778_v46  ;;  %v794_v0 = vmax.f32 %v792_v40, %v793_v47  ;;  %v1092_v49 = vadd.f32 %v1091_v48, %v1085_v35  ;;  %v1103_v25 = vmax.f32 %v1081_v11, %v1085_v35 }
 0x13f   : > { %v887_v24 = vadd.f32 %v886_v51, %v885_v30  ;;  %v901_v9 = vmax.f32 %v899_v3, %v900_v57  ;;  %v981_v37 = vmax.f32 %v971_v21, 0.0  ;;  %v1088_v38 = vmax.f32 %v1078_v6, 0.0 }
 0x140   : > { %v781_v42 = vmul.f32 0.015625, %v780_v33  ;;  %796 = vst [vmem:[%s1785_s10 + $0xc] sm:$0x1] %v794_v0  ;;  %v963_v56 = vadd.f32 %v1904_v28, %v1684_v34  ;;  %v1070_v15 = vadd.f32 %v1906_v20, %v1684_v34 }
 0x141   : > { %v888_v32 = vmul.f32 0.015625, %v887_v24  ;;  %903 = vst [vmem:[%s1785_s10 + $0xd] sm:$0x1] %v901_v9  ;;  %v999_v23 = vmax.f32 %v977_v4, %v981_v37  ;;  %v1106_v5 = vmax.f32 %v1084_v22, %v1088_v38 }
 0x142   : > { %795 = vst [vmem:[%s1785_s10 + $0x4] sm:$0x1] %v781_v42  ;;  %v979_v39 = vmax.f32 %v963_v56, 0.0  ;;  %v1086_v11 = vmax.f32 %v1070_v15, 0.0 }
 0x143   : > { %902 = vst [vmem:[%s1785_s10 + $0x5] sm:$0x1] %v888_v32  ;;  %v1001_v41 = vmax.f32 %v998_v19, %v999_v23  ;;  %v1108_v8 = vmax.f32 %v1105_v10, %v1106_v5 }
 0x144   : > { %v986_v31 = vadd.f32 %v985_v29, %v979_v39  ;;  %v997_v53 = vmax.f32 %v975_v1, %v979_v39  ;;  %v1093_v59 = vadd.f32 %v1092_v49, %v1086_v11  ;;  %v1104_v28 = vmax.f32 %v1082_v61, %v1086_v11 }
 0x146   : > { %v987_v13 = vadd.f32 %v986_v31, %v980_v60  ;;  %v1000_v34 = vmax.f32 %v996_v36, %v997_v53  ;;  %v1094_v20 = vadd.f32 %v1093_v59, %v1087_v63  ;;  %v1107_v52 = vmax.f32 %v1103_v25, %v1104_v28 }
 0x148   : > { %v988_v4 = vadd.f32 %v987_v13, %v981_v37  ;;  %v1002_v22 = vmax.f32 %v1000_v34, %v1001_v41  ;;  %v1095_v2 = vadd.f32 %v1094_v20, %v1088_v38  ;;  %v1109_v7 = vmax.f32 %v1107_v52, %v1108_v8 }
 0x14a   : > { %v989_v62 = vrot.slane %v988_v4, 4  ;;  %v1003_v12 = vrot.slane %v1002_v22, 4  ;;  %v1096_v14 = vrot.slane %v1095_v2, 4  ;;  %v1110_v18 = vrot.slane %v1109_v7, 4 }
 0x14c   : > { %v990_v55 = vadd.f32 %v989_v62, %v988_v4  ;;  %v1004_v26 = vmax.f32 %v1002_v22, %v1003_v12  ;;  %v1097_v1 = vadd.f32 %v1096_v14, %v1095_v2  ;;  %v1111_v50 = vmax.f32 %v1109_v7, %v1110_v18 }
 0x14e   : > { %v991_v27 = vrot.slane %v990_v55, 2  ;;  %v1005_v61 = vrot.slane %v1004_v26, 2  ;;  %v1098_v60 = vrot.slane %v1097_v1, 2  ;;  %v1112_v19 = vrot.slane %v1111_v50, 2 }
 0x150   : > { %v992_v63 = vadd.f32 %v991_v27, %v990_v55  ;;  %v1006_v10 = vmax.f32 %v1004_v26, %v1005_v61  ;;  %v1099_v54 = vadd.f32 %v1098_v60, %v1097_v1  ;;  %v1113_v16 = vmax.f32 %v1111_v50, %v1112_v19 }
 0x152   : > { %v993_v45 = vrot.slane %v992_v63, 1  ;;  %v1007_v58 = vrot.slane %v1006_v10, 1  ;;  %v1100_v46 = vrot.slane %v1099_v54, 1  ;;  %v1114_v40 = vrot.slane %v1113_v16, 1 }
 0x154   : > { %v994_v44 = vadd.f32 %v993_v45, %v992_v63  ;;  %v1008_v48 = vmax.f32 %v1006_v10, %v1007_v58  ;;  %v1101_v30 = vadd.f32 %v1100_v46, %v1099_v54  ;;  %v1115_v3 = vmax.f32 %v1113_v16, %v1114_v40 }
 0x156   : > { %v995_v17 = vmul.f32 0.015625, %v994_v44  ;;  %1010 = vst [vmem:[%s1785_s10 + $0xe] sm:$0x1] %v1008_v48  ;;  %v1102_v21 = vmul.f32 0.015625, %v1101_v30  ;;  %1117 = vst [vmem:[%s1785_s10 + $0xf] sm:$0x1] %v1115_v3 }
 0x158   : > { %1009 = vst [vmem:[%s1785_s10 + $0x6] sm:$0x1] %v995_v17  ;;  %1116 = vst [vmem:[%s1785_s10 + $0x7] sm:$0x1] %v1102_v21 }
 0x159   : > { %1435 = shalt.err (!%p1432_p3)
}
 0x15a   : > { %s1436_s29 = scalar_lea.hbm %s1993_s24, 256  ;;  %s1440_s5 = scalar_lea.hbm %s2042_s3, 512 }
 0x15b   : > { %p1437_p4 = scmp.ne.s32.totalorder %s1993_s24, %s1436_s29  ;;  %p1441_p9 = scmp.lt.u32.totalorder %s1993_s24, %s2042_s3 }
 0x15c   : > { %p1442_p10 = scmp.lt.u32.totalorder %s1440_s5, %s1436_s29  ;;  %p1444_p12 = scmp.lt.u32.totalorder %s1436_s29, %s1993_s24 }
 0x15d   : > { %p1438_p7 = pnand %p1437_p4, %p1546_p5 }
 0x15e   : > { %p1443_p11 = por %p1442_p10, %p1441_p9 }
 0x15f   : > { %p1439_p8 = pneg %p1438_p7 }
 0x160   : > { %p1445_p13 = por %p1444_p12, %p1443_p11 }
 0x162   : > { %p1446_p0 = pnand %p1445_p13, %p1439_p8 }
 0x164   : > { %1449 = shalt.err (!%p1446_p0)
}
 0x165   : > { %1376 = dma.vmem_to_hbm [thread:$0]  (%p1546_p5), %s1995_s17, 256, %s1993_s24, %s1119_s16  }
 0x166 PF: > { %p1382_p1 = scmp.ge.s32.totalorder %s1484_s15, 2  ;;  %s1145_s7 = sand.u32 1, %s1472_s12  }
 0x167   : > { %s1146_s9 = scalar_lea.sflag [#allocation3], %s1145_s7 }
 0x168   : > { %p1379_p2 = pnand %p1382_p1, %p1550_p6 }
 0x16a   : > { %1467 = dma.done.wait (!%p1379_p2), %s1146_s9, 256  }
 0x16b   : > { %1469 = vsyncadd (!%p1379_p2), %s1146_s9, 4294967040  ;;  %p13_p3 = scmp.ge.s32.totalorder %s1533_s18, 4   ;;  %s2045_s12 = smov %s1476_s13 }
 0x16c   : > { %s2046_s13 = smov %s1480_s14  ;;  %s2047_s14 = smov %s1544_s21 }
 0x16d   : > { %s2048_s15 = smov %s1533_s18  ;;  %15 = sbr.rel (!%p13_p3) target bundleno = 3 (0x3), region = 74 }
 0x174   :  { %1151 = vsyncpa [#allocation3], 1 }
 0x175   :  { %1153 = vsyncpa [#allocation3 + $0x1], 1 }

</bundles_post_ra>
